<compile_context>
chip_gen: v5e
topology: v5e:2x2
jax: 0.10.0
libtpu: 0.0.40
codegen_flags: <defaults>
</compile_context>

<pallas_src>
import jax
import jax.numpy as jnp
from jax.experimental import pallas as pl
from jax.experimental.pallas import tpu as pltpu


def _hswish_kernel(x_ref, o_ref):
    x = x_ref[...]
    # relu6(x + 3) == clamp(x + 3, 0, 6); everything stays elementwise (VPU).
    o_ref[...] = x * jnp.clip(x + 3.0, 0.0, 6.0) * (1.0 / 6.0)


def _hswish_2d(x2d: jax.Array, block_rows: int) -> jax.Array:
    rows, lanes = x2d.shape
    grid = (pl.cdiv(rows, block_rows),)
    return pl.pallas_call(
        _hswish_kernel,
        out_shape=jax.ShapeDtypeStruct((rows, lanes), x2d.dtype),
        grid=grid,
        in_specs=[pl.BlockSpec((block_rows, lanes), lambda i: (i, 0))],
        out_specs=pl.BlockSpec((block_rows, lanes), lambda i: (i, 0)),
        compiler_params=pltpu.CompilerParams(
            dimension_semantics=("parallel",),
            vmem_limit_bytes=32 * 1024 * 1024,
        ),
    )(x2d)


# Widest lane-dense layout that divides the element count wins.
_LANE_CHOICES = (1024, 512, 256, 128)
# ~2 MiB per block buffer; in+out double-buffered -> ~8 MiB live VMEM.
_TARGET_BLOCK_BYTES = 2 * 1024 * 1024


def hswish(x: jax.Array) -> jax.Array:
    """Hard-swish applied elementwise. Accepts any shape (e.g. NCHW)."""
    orig_shape = x.shape
    dtype = x.dtype
    n = x.size

    # Pick the widest lane count that divides n (typical NCHW sizes hit 1024).
    lanes = next((l for l in _LANE_CHOICES if n % l == 0), None)
    pad = 0
    if lanes is None:
        # Rare fallback: pad only to the minimal 128-lane multiple.
        lanes = 128
        pad = (-n) % lanes

    x_flat = jnp.ravel(x)            # free: row-major reshape, no HBM copy
    if pad:
        x_flat = jnp.pad(x_flat, (0, pad))

    rows = x_flat.size // lanes
    x2d = x_flat.reshape(rows, lanes)

    itemsize = jnp.dtype(dtype).itemsize
    block_rows = max(32, (_TARGET_BLOCK_BYTES // (lanes * itemsize)) // 32 * 32)
    if rows < block_rows:
        # Block covering the full sublane extent is always a legal block shape.
        block_rows = rows

    out2d = _hswish_2d(x2d, block_rows)

    out_flat = out2d.reshape(-1)
    if pad:
        out_flat = out_flat[:n]
    return out_flat.reshape(orig_shape)


def hswish_ref(x):
    return x * jnp.clip(x + 3.0, 0.0, 6.0) / 6.0


if __name__ == "__main__":
    key = jax.random.PRNGKey(0)
    x = jax.random.normal(key, (2, 4, 16, 16), dtype=jnp.float32) * 4.0

    out = hswish(x)
    jax.block_until_ready(out)

    ref = hswish_ref(x)
    assert out.shape == x.shape and out.dtype == x.dtype
    assert jnp.allclose(out, ref, atol=1e-6, rtol=1e-6)
    print("KERNEL_OK")
</pallas_src>

<mosaic_0001>
module attributes {stable_mosaic.version = 11 : i64} {
  func.func @_hswish_kernel(%arg0: i32, %arg1: memref<2x1024xf32, #tpu.memory_space<vmem>>, %arg2: memref<2x1024xf32, #tpu.memory_space<vmem>>) attributes {dimension_semantics = [#tpu.dimension_semantics<parallel>], iteration_bounds = array<i64: 1>, scalar_prefetch = 0 : i64, scratch_operands = 0 : i64, tpu.core_type = #tpu.core_type<tc>, window_params = [{transform_indices = @transform_0, window_bounds = array<i64: 2, 1024>}, {transform_indices = @transform_1, window_bounds = array<i64: 2, 1024>}]} {
    %c0 = arith.constant 0 : index
    %c0_0 = arith.constant 0 : index
    %0 = vector.load %arg1[%c0, %c0_0] : memref<2x1024xf32, #tpu.memory_space<vmem>>, vector<2x1024xf32>
    %cst = arith.constant 3.000000e+00 : f32
    %1 = vector.broadcast %cst : f32 to vector<2x1024xf32>
    %2 = arith.addf %0, %1 : vector<2x1024xf32>
    %cst_1 = arith.constant 0.000000e+00 : f32
    %cst_2 = arith.constant 6.000000e+00 : f32
    %3 = vector.broadcast %cst_1 : f32 to vector<2x1024xf32>
    %4 = arith.maximumf %3, %2 : vector<2x1024xf32>
    %5 = vector.broadcast %cst_2 : f32 to vector<2x1024xf32>
    %6 = arith.minimumf %5, %4 : vector<2x1024xf32>
    %7 = arith.mulf %0, %6 : vector<2x1024xf32>
    %cst_3 = arith.constant 0.166666672 : f32
    %8 = vector.broadcast %cst_3 : f32 to vector<2x1024xf32>
    %9 = arith.mulf %7, %8 : vector<2x1024xf32>
    %c0_4 = arith.constant 0 : index
    %c0_5 = arith.constant 0 : index
    %10 = vector.load %arg2[%c0_4, %c0_5] : memref<2x1024xf32, #tpu.memory_space<vmem>>, vector<2x1024xf32>
    tpu.vector_store %arg2[%c0_4, %c0_5], %9 {strides = array<i32>} : memref<2x1024xf32, #tpu.memory_space<vmem>>, vector<2x1024xf32>,
    return
  }
  func.func @transform_0(%arg0: i32) -> (i32, i32) {
    %c0_i32 = arith.constant 0 : i32
    %c0_i32_0 = arith.constant 0 : i32
    return %arg0, %c0_i32 : i32, i32
  }
  func.func @transform_1(%arg0: i32) -> (i32, i32) {
    %c0_i32 = arith.constant 0 : i32
    %c0_i32_0 = arith.constant 0 : i32
    return %arg0, %c0_i32 : i32, i32
  }
}

</mosaic_0001>

<bundles_post_ra>
// kernel: tpu_custom_call.1
= control target key start
LH: loop header
LB: loop body
LE: loop exit
PB: predicated region body
PF: predicated region fallthrough
CT: control target
= control target key end

     0   :  { %6 = vsyncpa [#allocation3], 0  ;;  %s126_s0 = inlined_call_operand.hbm [shape: f32[2,1024], index: 0, kind: input, shape index: {}]   ;;  %s127_s1 = inlined_call_operand.hbm [shape: f32[2,1024], index: 1, kind: output, shape index: {}]  }
   0x1   :  { %7 = vsyncpa [#allocation4], 0  ;;  %s13_s8 = sshll.u32 %s126_s0, 4  ;;  %s108_s9 = smov [#allocation2]   ;;  %s14_s8 = int_to_ptr.hbm [resolvable:$true] %s13_s8 }
   0x2   :  { %s15_s10 = sshll.u32 %s108_s9, 4  ;;  %s16_s10 = int_to_ptr.vmem [resolvable:$true] %s15_s10 }
   0x3   :  { %18 = dma.hbm_to_vmem [thread:$0]  %s14_s8, 256, %s16_s10, [#allocation3]  }
   0x4   :  { %104 = dma.done.wait [#allocation3], 256  }
   0x5   :  { %105 = vsyncadd [#allocation3], 4294967040  ;;  %v23_v0 = vld [vmem:[#allocation2] sm:$0xff]  ;;  %v24_v1 = vld [vmem:[#allocation2 + $0x8] sm:$0xff]  ;;  %s109_s11 = smov [#allocation5]   ;;  %s44_s14 = sshll.u32 %s127_s1, 4  ;;  %s45_s14 = int_to_ptr.hbm [resolvable:$true] %s44_s14 }
   0x6   :  { %v25_v2 = vadd.f32 3.0, %v23_v0  ;;  %v26_v3 = vadd.f32 3.0, %v24_v1  ;;  %s42_s12 = sshll.u32 %s109_s11, 4  ;;  %s43_s12 = int_to_ptr.vmem [resolvable:$true] %s42_s12 }
   0x8   :  { %v27_v4 = vmax.f32 %v25_v2, 0.0  ;;  %v28_v5 = vmax.f32 %v26_v3, 0.0 }
   0xa   :  { %v29_v6 = vmin.f32 %v27_v4, 6.0  ;;  %v30_v7 = vmin.f32 %v28_v5, 6.0 }
   0xc   :  { %v31_v8 = vmul.f32 %v29_v6, %v23_v0  ;;  %v32_v9 = vmul.f32 %v30_v7, %v24_v1 }
   0xe   :  { %v33_v10 = vmul.f32 0.16666667, %v31_v8  ;;  %v34_v11 = vmul.f32 0.16666667, %v32_v9 }
  0x10   :  { %35 = vst [vmem:[#allocation5] sm:$0xff] %v33_v10 }
  0x11   :  { %36 = vst [vmem:[#allocation5 + $0x8] sm:$0xff] %v34_v11 }
  0x12   :  { %47 = dma.vmem_to_hbm [thread:$0]  %s43_s12, 256, %s45_s14, [#allocation4]  }
  0x13   :  { %106 = dma.done.wait [#allocation4], 256  }
  0x14   :  { %107 = vsyncadd [#allocation4], 4294967040 }
  0x15   :  { %52 = vsyncpa [#allocation3], 1 }
  0x16   :  { %53 = vsyncpa [#allocation4], 1 }

</bundles_post_ra>
